<compile_context>
chip_gen: v7x
topology: tpu7x:2x2x1
jax: 0.10.0
libtpu: 0.0.40
codegen_flags: <defaults>
</compile_context>

<pallas_src>
import math

import jax
import jax.numpy as jnp
from jax import lax
from jax.experimental import pallas as pl
from jax.experimental.pallas import tpu as pltpu


def _self_attention_kernel(x_ref, w_ref, b_ref, o_ref):
    # x_ref block: (Bt, L, D)
    # w_ref:       (D, 3D)  fused [Wq^T | Wk^T | Wv^T], bf16, VMEM-resident
    # b_ref:       (1, 3D)  fused [bq | bk | bv], f32,  VMEM-resident
    Bt, L, D = x_ref.shape

    x = x_ref[...].astype(jnp.bfloat16)                       # (Bt, L, D)

    # Single fused QKV projection: (Bt*L, D) @ (D, 3D) -> (Bt*L, 3D), f32 acc.
    qkv = lax.dot_general(
        x.reshape(Bt * L, D), w_ref[...],
        dimension_numbers=(((1,), (0,)), ((), ())),
        preferred_element_type=jnp.float32) + b_ref[...]
    qkv = qkv.reshape(Bt, L, 3 * D)

    q = qkv[..., 0 * D:1 * D]
    k = qkv[..., 1 * D:2 * D]
    v = qkv[..., 2 * D:3 * D]

    # Fold the 1/sqrt(D) scale into q (fewer elements than the (L, L) scores
    # whenever L >= D); do it in f32 before the bf16 cast.
    scale = 1.0 / math.sqrt(D)
    q = (q * scale).astype(jnp.bfloat16)
    k = k.astype(jnp.bfloat16)
    v = v.astype(jnp.bfloat16)

    # Batched QK^T: contract the feature dims directly (no explicit k.T).
    scores = lax.dot_general(
        q, k,
        dimension_numbers=(((2,), (2,)), ((0,), (0,))),
        preferred_element_type=jnp.float32)                    # (Bt, L, L)

    # Numerically stable softmax over the last axis (f32 on VPU/EUP).
    m = jnp.max(scores, axis=-1, keepdims=True)
    p = jnp.exp(scores - m)
    denom = jnp.sum(p, axis=-1, keepdims=True)
    attn = p * pl.reciprocal(denom, approx=True)

    # Batched attention @ V, bf16 inputs, f32 accumulation.
    out = lax.dot_general(
        attn.astype(jnp.bfloat16), v,
        dimension_numbers=(((2,), (1,)), ((0,), (0,))),
        preferred_element_type=jnp.float32)                    # (Bt, L, D)

    o_ref[...] = out.astype(o_ref.dtype)


def self_attention_layer(x, wq, bq, wk, bk, wv, bv, *, max_bt=8):
    """x: (B, L, D); w*: (D, D) torch layout (out, in); b*: (D,)."""
    B, L, D = x.shape

    # Parameter glue (plain JAX, done once): fuse the three projections into
    # one (D, 3D) operand so the kernel's single x @ W_qkv matmul reproduces
    # torch's x @ W.T + b.  Weights in bf16 (MXU full rate); bias stays f32
    # (added after f32 accumulation).
    w_qkv = jnp.concatenate([wq.T, wk.T, wv.T], axis=1).astype(jnp.bfloat16)
    b_qkv = jnp.concatenate([bq, bk, bv]).reshape(1, 3 * D).astype(jnp.float32)

    # Batch several sequences per grid step to amortize per-step pipeline
    # overhead, but keep >= 2 grid steps (when B > 1) so the "parallel" batch
    # axis can be sharded across v7x's two TensorCores.
    bt = min(max_bt, B)
    if B > 1 and (B + bt - 1) // bt < 2:
        bt = (B + 1) // 2
    pad = (-B) % bt
    xp = jnp.pad(x, ((0, pad), (0, 0), (0, 0))) if pad else x
    Bp = B + pad
    grid = (Bp // bt,)

    out = pl.pallas_call(
        _self_attention_kernel,
        out_shape=jax.ShapeDtypeStruct((Bp, L, D), x.dtype),
        grid_spec=pltpu.PrefetchScalarGridSpec(
            num_scalar_prefetch=0,
            grid=grid,
            in_specs=[
                # x: pipelined over the batch axis, Bt sequences per step.
                pl.BlockSpec((bt, L, D), lambda b: (b, 0, 0)),
                # Fused weight/bias: whole-array VMEM residents (no blocking,
                # no per-step DMA, no double buffering).
                pl.BlockSpec(memory_space=pltpu.MemorySpace.VMEM),
                pl.BlockSpec(memory_space=pltpu.MemorySpace.VMEM),
            ],
            out_specs=pl.BlockSpec((bt, L, D), lambda b: (b, 0, 0)),
        ),
        compiler_params=pltpu.CompilerParams(
            dimension_semantics=("parallel",)),
    )(xp, w_qkv, b_qkv)

    return out[:B] if pad else out


def _reference(x, wq, bq, wk, bk, wv, bv):
    q = jnp.einsum("bld,ed->ble", x, wq) + bq
    k = jnp.einsum("bld,ed->ble", x, wk) + bk
    v = jnp.einsum("bld,ed->ble", x, wv) + bv
    scores = jnp.einsum("bld,bmd->blm", q, k) / math.sqrt(k.shape[-1])
    attn = jax.nn.softmax(scores, axis=-1)
    return jnp.einsum("blm,bmd->bld", attn, v)


if __name__ == "__main__":
    # configs.enc_in = D; small synthetic shapes.
    B, L, D = 2, 8, 32
    key = jax.random.PRNGKey(0)
    kx, kwq, kbq, kwk, kbk, kwv, kbv = jax.random.split(key, 7)

    x = jax.random.normal(kx, (B, L, D), dtype=jnp.float32)

    # Deterministic parameter init (same uniform range as torch nn.Linear).
    bound = 1.0 / math.sqrt(D)
    wq = jax.random.uniform(kwq, (D, D), jnp.float32, -bound, bound)
    bq = jax.random.uniform(kbq, (D,), jnp.float32, -bound, bound)
    wk = jax.random.uniform(kwk, (D, D), jnp.float32, -bound, bound)
    bk = jax.random.uniform(kbk, (D,), jnp.float32, -bound, bound)
    wv = jax.random.uniform(kwv, (D, D), jnp.float32, -bound, bound)
    bv = jax.random.uniform(kbv, (D,), jnp.float32, -bound, bound)

    out = self_attention_layer(x, wq, bq, wk, bk, wv, bv)
    out = jax.block_until_ready(out)

    ref = _reference(x, wq, bq, wk, bk, wv, bv)
    assert out.shape == (B, L, D)
    # bf16 MXU inputs + approx reciprocal -> relaxed tolerance vs f32 reference.
    assert jnp.allclose(out, ref, atol=2e-2, rtol=2e-2), "mismatch vs reference"

    print("KERNEL_OK")
</pallas_src>

<mosaic_0001>
module attributes {stable_mosaic.version = 11 : i64} {
  func.func @_self_attention_kernel(%arg0: i32, %arg1: memref<1x8x32xf32, #tpu.memory_space<vmem>>, %arg2: memref<32x96xbf16, #tpu.memory_space<vmem>>, %arg3: memref<1x96xf32, #tpu.memory_space<vmem>>, %arg4: memref<1x8x32xf32, #tpu.memory_space<vmem>>) attributes {dimension_semantics = [#tpu.dimension_semantics<parallel>], iteration_bounds = array<i64: 2>, scalar_prefetch = 0 : i64, scratch_operands = 0 : i64, tpu.core_type = #tpu.core_type<tc>, window_params = [{transform_indices = @transform_0, window_bounds = array<i64: 1, 8, 32>}, {pipeline_mode = #tpu.pipeline_mode<synchronous>, transform_indices = @transform_1, window_bounds = array<i64: 32, 96>}, {pipeline_mode = #tpu.pipeline_mode<synchronous>, transform_indices = @transform_2, window_bounds = array<i64: 1, 96>}, {transform_indices = @transform_3, window_bounds = array<i64: 1, 8, 32>}]} {
    %c0 = arith.constant 0 : index
    %c0_0 = arith.constant 0 : index
    %c0_1 = arith.constant 0 : index
    %0 = vector.load %arg1[%c0, %c0_0, %c0_1] : memref<1x8x32xf32, #tpu.memory_space<vmem>>, vector<1x8x32xf32>
    %1 = arith.truncf %0 : vector<1x8x32xf32> to vector<1x8x32xbf16>
    %2 = vector.shape_cast %1 : vector<1x8x32xbf16> to vector<8x32xbf16>
    %c0_2 = arith.constant 0 : index
    %c0_3 = arith.constant 0 : index
    %3 = vector.load %arg2[%c0_2, %c0_3] : memref<32x96xbf16, #tpu.memory_space<vmem>>, vector<32x96xbf16>
    %cst = arith.constant dense<0.000000e+00> : vector<8x96xf32>
    %4 = tpu.matmul %2, %3, %cst {dimension_numbers = #tpu.dot_dimension_numbers<[1], [0], [0], [1], [0, 0, 1, 1], [], []>} : vector<8x32xbf16>, vector<32x96xbf16>, vector<8x96xf32> -> vector<8x96xf32>
    %c0_4 = arith.constant 0 : index
    %c0_5 = arith.constant 0 : index
    %5 = vector.load %arg3[%c0_4, %c0_5] : memref<1x96xf32, #tpu.memory_space<vmem>>, vector<1x96xf32>
    %6 = vector.broadcast %5 : vector<1x96xf32> to vector<8x96xf32>
    %7 = arith.addf %4, %6 : vector<8x96xf32>
    %8 = vector.shape_cast %7 : vector<8x96xf32> to vector<1x8x96xf32>
    %9 = vector.extract_strided_slice %8 {offsets = [0, 0, 0], sizes = [1, 8, 32], strides = [1, 1, 1]} : vector<1x8x96xf32> to vector<1x8x32xf32>
    %10 = vector.extract_strided_slice %8 {offsets = [0, 0, 32], sizes = [1, 8, 32], strides = [1, 1, 1]} : vector<1x8x96xf32> to vector<1x8x32xf32>
    %11 = vector.extract_strided_slice %8 {offsets = [0, 0, 64], sizes = [1, 8, 32], strides = [1, 1, 1]} : vector<1x8x96xf32> to vector<1x8x32xf32>
    %cst_6 = arith.constant 0.176776692 : f32
    %12 = vector.broadcast %cst_6 : f32 to vector<1x8x32xf32>
    %13 = arith.mulf %9, %12 : vector<1x8x32xf32>
    %14 = arith.truncf %13 : vector<1x8x32xf32> to vector<1x8x32xbf16>
    %15 = arith.truncf %10 : vector<1x8x32xf32> to vector<1x8x32xbf16>
    %16 = arith.truncf %11 : vector<1x8x32xf32> to vector<1x8x32xbf16>
    %cst_7 = arith.constant dense<0.000000e+00> : vector<1x8x8xf32>
    %17 = tpu.matmul %14, %15, %cst_7 {dimension_numbers = #tpu.dot_dimension_numbers<[2], [2], [1], [1], [0, 0, 0, 1, 1, 1], [0], [0]>} : vector<1x8x32xbf16>, vector<1x8x32xbf16>, vector<1x8x8xf32> -> vector<1x8x8xf32>
    %cst_8 = arith.constant dense<0xFF800000> : vector<1x8xf32>
    %18 = vector.multi_reduction <maximumf>, %17, %cst_8 [2] : vector<1x8x8xf32> to vector<1x8xf32>
    %19 = vector.shape_cast %18 : vector<1x8xf32> to vector<1x8x1xf32>
    %20 = vector.broadcast %19 : vector<1x8x1xf32> to vector<1x8x8xf32>
    %21 = arith.subf %17, %20 : vector<1x8x8xf32>
    %22 = math.exp %21 : vector<1x8x8xf32>
    %cst_9 = arith.constant dense<0.000000e+00> : vector<1x8xf32>
    %23 = vector.multi_reduction <add>, %22, %cst_9 [2] : vector<1x8x8xf32> to vector<1x8xf32>
    %24 = vector.shape_cast %23 : vector<1x8xf32> to vector<1x8x1xf32>
    %25 = tpu.reciprocal %24 {approx = true} : vector<1x8x1xf32> -> vector<1x8x1xf32>
    %26 = vector.broadcast %25 : vector<1x8x1xf32> to vector<1x8x8xf32>
    %27 = arith.mulf %22, %26 : vector<1x8x8xf32>
    %28 = arith.truncf %27 : vector<1x8x8xf32> to vector<1x8x8xbf16>
    %cst_10 = arith.constant dense<0.000000e+00> : vector<1x8x32xf32>
    %29 = tpu.matmul %28, %16, %cst_10 {dimension_numbers = #tpu.dot_dimension_numbers<[2], [1], [1], [2], [0, 0, 0, 1, 1, 2], [0], [0]>} : vector<1x8x8xbf16>, vector<1x8x32xbf16>, vector<1x8x32xf32> -> vector<1x8x32xf32>
    %c0_11 = arith.constant 0 : index
    %c0_12 = arith.constant 0 : index
    %c0_13 = arith.constant 0 : index
    %30 = vector.load %arg4[%c0_11, %c0_12, %c0_13] : memref<1x8x32xf32, #tpu.memory_space<vmem>>, vector<1x8x32xf32>
    tpu.vector_store %arg4[%c0_11, %c0_12, %c0_13], %29 {strides = array<i32>} : memref<1x8x32xf32, #tpu.memory_space<vmem>>, vector<1x8x32xf32>,
    return
  }
  func.func @transform_0(%arg0: i32) -> (i32, i32, i32) {
    %c0_i32 = arith.constant 0 : i32
    %c0_i32_0 = arith.constant 0 : i32
    %c0_i32_1 = arith.constant 0 : i32
    return %arg0, %c0_i32, %c0_i32_0 : i32, i32, i32
  }
  func.func @transform_1(%arg0: i32) -> (i32, i32) {
    %c0_i32 = arith.constant 0 : i32
    %c0_i32_0 = arith.constant 0 : i32
    %c0_i32_1 = arith.constant 0 : i32
    return %c0_i32, %c0_i32_0 : i32, i32
  }
  func.func @transform_2(%arg0: i32) -> (i32, i32) {
    %c0_i32 = arith.constant 0 : i32
    %c0_i32_0 = arith.constant 0 : i32
    %c0_i32_1 = arith.constant 0 : i32
    return %c0_i32, %c0_i32_0 : i32, i32
  }
  func.func @transform_3(%arg0: i32) -> (i32, i32, i32) {
    %c0_i32 = arith.constant 0 : i32
    %c0_i32_0 = arith.constant 0 : i32
    %c0_i32_1 = arith.constant 0 : i32
    return %arg0, %c0_i32, %c0_i32_0 : i32, i32, i32
  }
}

</mosaic_0001>

<bundles_post_ra>
// kernel: tpu_custom_call.1
= control target key start
LH: loop header
LB: loop body
LE: loop exit
PB: predicated region body
PF: predicated region fallthrough
CT: control target
= control target key end

     0   :  { %8 = vsyncpa [#allocation3], 0  ;;  %s965_s0 = inlined_call_operand.hbm [shape: f32[2,8,32], index: 0, kind: input, shape index: {}]   ;;  %s966_s1 = inlined_call_operand.hbm [shape: bf16[32,96], index: 1, kind: input, shape index: {}]   ;;  %s967_s2 = inlined_call_operand.vmem [shape: f32[1,96], index: 2, kind: input, shape index: {}]   ;;  %s968_s3 = inlined_call_operand.hbm [shape: f32[2,8,32], index: 3, kind: output, shape index: {}]  }
   0x1   :  { %10 = vsyncpa [#allocation3 + $0x1], 0 }
   0x2   :  { %11 = vsyncpa [#allocation6], 0 }
   0x3   :  { %12 = vsyncpa [#allocation4], 0 }
   0x4   :  { %14 = vsyncpa [#allocation4 + $0x1], 0  ;;  %s755_s12 = smov 0   ;;  %s757_s13 = smov 0  }
   0x5   :  { %s759_s14 = smov 0   ;;  %s761_s15 = smov 0  }
   0x6 LB: > { %s776_s16 = sadd.s32 4294967295, %s724_s15   ;;  %s480_s17 = sadd.s32 4294967294, %s724_s15   ;;  %s724_s15 = sphi %s761_s15, %s988_s15   ;;  %s720_s14 = sphi %s759_s14, %s987_s14   ;;  %s716_s13 = sphi %s757_s13, %s986_s13   ;;  %s712_s12 = sphi %s755_s12, %s985_s12  }
   0x7   : > { %p40_p0 = scmp.ne.s32.totalorder %s716_s13, %s712_s12  ;;  %p969_p1 = scmp.eq.s32.totalorder %s776_s16, 0 }
   0x8   : > { %p112_p3 = scmp.eq.s32.totalorder %s480_s17, 1  ;;  %p481_p5 = scmp.ge.s32.totalorder %s724_s15, 1 }
   0x9   : > { %p785_p4 = por %p969_p1, %p40_p0  ;;  %p119_p7 = scmp.lt.s32.totalorder %s724_s15, 3 }
   0xa   : > { %p790_p6 = por %p112_p3, %p40_p0  ;;  %s726_s21 = smov [#allocation5]  }
   0xb   : > { %s972_s18 = scalar_select %p785_p4, 1, 0 }
   0xc   : > { %s973_s19 = scalar_select %p790_p6, 1, 0 }
   0xd   : > { %p795_p8 = pnand %p481_p5, %p119_p7  ;;  %s131_s22 = sshll.u32 %s726_s21, 4  ;;  %s799_s22 = int_to_ptr.vmem [resolvable:$true] %s131_s22 }
   0xe   : > { %s811_s24 = sadd.s32 1, %s724_s15   ;;  %s27_s25 = sadd.s32 1, %s720_s14 }
   0xf   : > { %s974_s20 = scalar_select %p795_p8, 1, 0 }
  0x10   : > { %p535_p9 = pneg %p795_p8  ;;  %s24_s26 = ssub.s32 %s724_s15, %s811_s24 }
  0x11   : > { %s596_s29 = scalar_lea.hbm %s966_s1, 256 }
  0x12   : > { %p806_p11 = pnand %p535_p9, %p969_p1  ;;  %p597_p12 = scmp.ne.s32.totalorder %s966_s1, %s596_s29 }
  0x13   : > { %p603_p5 = scmp.lt.u32.totalorder %s596_s29, %s966_s1 }
  0x14   : > { %p598_p13 = pneg %p806_p11 }
  0x16   : > { %p599_p0 = pnand %p598_p13, %p597_p12 }
  0x18   : > { %p600_p3 = pneg %p599_p0 }
  0x1a   : > { %p605_p7 = pnand %p603_p5, %p600_p3 }
  0x1c   : > { %608 = shalt.err (!%p605_p7)
}
  0x1d   : > { %s609_s7 = scalar_lea.vmem %s799_s22, 256  ;;  %p617_p2 = scmp.lt.s32.totalorder %s799_s22, %s799_s22 }
  0x1e   : > { %p610_p9 = scmp.ne.s32.totalorder %s799_s22, %s609_s7  ;;  %p618_p6 = scmp.lt.s32.totalorder %s609_s7, %s609_s7 }
  0x20   : > { %p612_p10 = pnand %p610_p9, %p598_p13  ;;  %p619_p4 = por %p618_p6, %p617_p2 }
  0x22   : > { %p613_p1 = pneg %p612_p10 }
  0x24   : > { %p620_p8 = pnand %p619_p4, %p613_p1 }
  0x26   : > { %623 = shalt.err (!%p620_p8)
}
  0x27   : > { %s727_s8 = smov 64   ;;  %s728_s9 = smov 4  }
  0x28   : > { %538 = dma.hbm_to_vmem [thread:$0]  (!%p806_p11), %s966_s1, 256, %s799_s22, [#allocation6], %s727_s8, %s727_s8, %s728_s9  }
  0x29   : > { %p25_p2 = scmp.eq.s32.totalorder %s24_s26, 0  ;;  %p34_p1 = scmp.ne.s32.totalorder %s720_s14, %s716_s13 }
  0x2a   : > { %p35_p4 = scmp.eq.s32.totalorder %s724_s15, 0  ;;  %p548_p6 = scmp.lt.s32.totalorder %s724_s15, 2 }
  0x2b   : > { %s842_s17 = scalar_select %p25_p2, %s720_s14, %s27_s25  }
  0x2c   : > { %p36_p8 = por %p35_p4, %p34_p1  ;;  %p976_p10 = scmp.eq.s32.totalorder %s776_s16, 1 }
  0x2d   : > { %s148_s27 = sand.u32 1, %s720_s14   ;;  %s485_s28 = sshll.u32 %s724_s15, 7 }
  0x2e   : > { %p846_p12 = por %p976_p10, %p34_p1  ;;  %s484_s29 = sshll.u32 %s148_s27, 3 }
  0x2f   : > { %s855_s4 = scalar_lea.hbm %s965_s0, %s485_s28  ;;  %s152_s22 = scalar_lea.vmem [#allocation2], %s484_s29 }
  0x30   : > { %s159_s25 = sshll.u32 %s152_s22, 4  ;;  %p857_p11 = pnand %p548_p6, %p36_p8  ;;  %s861_s25 = int_to_ptr.vmem [resolvable:$true] %s159_s25 }
  0x31   : > { %s149_s5 = scalar_lea.sflag [#allocation3], %s148_s27  ;;  %s624_s6 = scalar_lea.hbm %s855_s4, 128 }
  0x32   : > { %p625_p13 = scmp.ne.s32.totalorder %s855_s4, %s624_s6  ;;  %p626_p0 = pneg %p857_p11 }
  0x33   : > { %s629_s9 = scalar_lea.hbm %s965_s0, 256  ;;  %p630_p7 = scmp.lt.u32.totalorder %s855_s4, %s965_s0 }
  0x34   : > { %p627_p3 = pnand %p626_p0, %p625_p13  ;;  %p631_p9 = scmp.lt.u32.totalorder %s629_s9, %s624_s6 }
  0x35   : > { %p633_p1 = scmp.lt.u32.totalorder %s624_s6, %s855_s4 }
  0x36   : > { %p628_p5 = pneg %p627_p3  ;;  %p632_p2 = por %p631_p9, %p630_p7 }
  0x38   : > { %p634_p4 = por %p633_p1, %p632_p2 }
  0x3a   : > { %p635_p6 = pnand %p634_p4, %p628_p5 }
  0x3c   : > { %638 = shalt.err (!%p635_p6)
}
  0x3d   : > { %s639_s27 = scalar_lea.vmem %s861_s25, 128  ;;  %s729_s28 = smov [#allocation2]  }
  0x3e   : > { %p640_p8 = scmp.ne.s32.totalorder %s861_s25, %s639_s27  ;;  %s644_s29 = sshll.u32 %s729_s28, 4  ;;  %s645_s29 = int_to_ptr.vmem [resolvable:$false] %s644_s29 }
  0x3f   : > { %s646_s23 = scalar_lea.vmem %s645_s29, 256  ;;  %p647_p3 = scmp.lt.s32.totalorder %s861_s25, %s645_s29 }
  0x40   : > { %p642_p10 = pnand %p640_p8, %p626_p0  ;;  %p648_p7 = scmp.lt.s32.totalorder %s646_s23, %s639_s27 }
  0x42   : > { %p643_p13 = pneg %p642_p10  ;;  %p649_p9 = por %p648_p7, %p647_p3 }
  0x44   : > { %p650_p2 = pnand %p649_p9, %p643_p13 }
  0x46   : > { %653 = shalt.err (!%p650_p2)
}
  0x47   : > { %542 = dma.hbm_to_vmem [thread:$0]  (!%p857_p11), %s855_s4, 128, %s861_s25, %s149_s5  }
  0x48   : > { %p979_p5 = scmp.ne.s32.totalorder %s974_s20, 0 }
  0x49   : > { %s891_s30 = sand.u32 (!%p979_p5), 1, %s716_s13   ;;  %p980_p0 = scmp.ne.s32.totalorder (!%p979_p5), %s972_s18, 0 }
  0x4a   : > { %168 = sbr.rel (%p979_p5) target bundleno = 1189 (0x4a5), region = 32  ;;  %s487_s22 = sshll.u32 (!%p979_p5), %s891_s30, 3 }
  0x4b   : > { %s171_s6 = scalar_lea.sflag (!%p979_p5), [#allocation3], %s891_s30  ;;  %s174_s7 = scalar_lea.vmem (!%p979_p5), [#allocation2], %s487_s22 }
  0x51   : > { %699 = dma.done.wait (%p980_p0), %s171_s6, 128  }
  0x52   : > { %701 = vsyncadd (%p980_p0), %s171_s6, 4294967168  ;;  %p981_p11 = scmp.eq.s32.totalorder %s776_s16, 0 }
  0x54   : > { %703 = dma.done.wait (%p981_p11), [#allocation6], 256   ;;  %p982_p1 = pmov %p981_p11 }
  0x55   : > { %v730_v0 = vmov 0.0   ;;  %vm731_vm0 = vmmov 0   ;;  %v590_v1 = vld [vmem:[#allocation5] sm:$0xff]   ;;  %v591_v2 = vld [vmem:[#allocation5 + $0x8] sm:$0xff]   ;;  %v202_v3 = vld [vmem:[%s174_s7] sm:$0xff]  ;;  %vm227_vm1 = vcmask 261120  }
  0x56   : > { %705 = vsyncadd (%p982_p1), [#allocation6], 4294967040  ;;  %507 = vmatprep.subr.bf16.mxu0 %v730_v0  ;;  %511 = vmatprep.mubr.msk.bf16.mxu0 %vm731_vm0, %v730_v0  ;;  %v203_v4 = vpack.c.bf16 %v202_v3, %v202_v3  ;;  %v490_v5 = vld [vmem:[%s967_s2] ss:$0 sm:$0xff]  ;;  %s732_s4 = smov 96   ;;  %vm323_vm2 = vcmask 64512  }
  0x57   : > { %515 = vmatprep.subr.bf16.mxu1 %v730_v0  ;;  %517 = vmatprep.mubr.msk.bf16.mxu1 %vm731_vm0, %v730_v0  ;;  %s733_s25 = smov 64   ;;  %vm341_vm3 = vcmask 1043456   ;;  %s497_s26 = sshll.u32 %s776_s16, 7 }
  0x58   : > { %508 = vmatpush3.bf16.msra.mxu0 %v590_v1  ;;  %s200_s5 = scalar_lea.vmem [#allocation7], %s487_s22  ;;  %s920_s11 = scalar_lea.hbm %s968_s3, %s497_s26 }
  0x59   : > { %509 = vmatprep.subr.bf16.mxu0 %v730_v0  ;;  %s400_s8 = sshll.u32 %s200_s5, 4  ;;  %s387_s27 = scalar_lea.sflag [#allocation4], %s891_s30  ;;  %s922_s8 = int_to_ptr.vmem [resolvable:$true] %s400_s8 }
  0x5a   : > { %s654_s16 = scalar_lea.vmem %s922_s8, 128  ;;  %s734_s28 = smov [#allocation7]  }
  0x5b   : > { %p655_p4 = scmp.ne.s32.totalorder %s922_s8, %s654_s16  ;;  %s658_s29 = sshll.u32 %s734_s28, 4  ;;  %s659_s29 = int_to_ptr.vmem [resolvable:$false] %s658_s29 }
  0x5c   : > { %510 = vmatpush3.bf16.msra.mxu0 %v591_v2  ;;  %s660_s23 = scalar_lea.vmem %s659_s29, 256  ;;  %p661_p10 = scmp.lt.s32.totalorder %s922_s8, %s659_s29 }
  0x5d   : > { %521 = vmatprep.subr.bf16.mxu0 %v730_v0  ;;  %p656_p6 = pnand %p655_p4, %p846_p12  ;;  %p662_p13 = scmp.lt.s32.totalorder %s660_s23, %s654_s16 }
  0x5f   : > { %512 = vmatmul.mubr.msk.bf16.vlgmr.msra.gmra.mrb[0].mxu0 %vm227_vm1, %v203_v4  ;;  %p657_p8 = pneg %p656_p6  ;;  %p663_p3 = por %p662_p13, %p661_p10 }
  0x60   : > { %523 = vmatprep.mubr.msk.bf16.mxu0 %vm731_vm0, %v730_v0 }
  0x61   : > { %p664_p7 = pnand %p663_p3, %p657_p8 }
 0x132   : > { %v265_v6 = vpop.f32.mrb[0].mxu0 }
 0x133   : > { %v266_v7 = vadd.f32 %v490_v5, %v265_v6  ;;  %v513_v8 = vpop.f32.mrb[1].mxu0 }
 0x134   : > { %v268_v9 = vpop.f32.mrb[2].mxu0 }
 0x135   : > { %v514_v10 = vpop.f32.mrb[3].mxu0  ;;  %v273_v11 = vpack.c.bf16 %v266_v7, %v266_v7  ;;  %v271_v14 = vmul.f32 0.17677669, %v266_v7 }
 0x137   : > { %275 = vrot.lane.b32.xlu0 %v273_v11, %s732_s4  ;;  %v272_v15 = vpack.c.bf16 %v271_v14, %v271_v14 }
 0x1a9   : > { %v276_v12 = vpop.permute.xlu0 %275 }
 0x1aa   : > { %v281_v13 = vsel %vm227_vm1, %v276_v12, 0 }
 0x1ab   : > { %516 = vmatpush3.bf16.xpose.msra.mxu1 %v281_v13 }
 0x1b2   : > { %518 = vmatmul.mubr.msk.bf16.vlgmr.msra.gmra.mrb[0].mxu1 %vm227_vm1, %v272_v15 }
 0x285   : > { %v317_v16 = vpop.f32.mrb[0].mxu1 }
 0x286   : > { %v519_v17 = vpop.f32.mrb[1].mxu1  ;;  %v324_v18 = vsel %vm323_vm2, %v317_v16, -inf }
 0x287   : > { %325 = vmax.xlane.f32.xlu0 %v324_v18  ;;  %v320_v19 = vpop.f32.mrb[2].mxu1 }
 0x288   : > { %v520_v20 = vpop.f32.mrb[3].mxu1 }
 0x314   : > { %v326_v21 = vpop.xlane.xlu0 %325 }
 0x315   : > { %v327_v22 = vsub.f32 %v317_v16, %v326_v21 }
 0x317   : > { %v328_v23 = vmul.f32 1.442695, %v327_v22 }
 0x319   : > { %592 = vpow2.f32 %v328_v23 }
 0x323   : > { %v593_v24 = vpop.eup %592 }
 0x324   : > { %v330_v25 = vsel %vm323_vm2, %v593_v24, 0.0 }
 0x325   : > { %331 = vadd.xlane.f32.xlu1 %v330_v25 }
 0x336   : > { %336 = vrot.lane.b32.xlu1 %v273_v11, %s733_s25 }
 0x3b2   : > { %v332_v26 = vpop.xlane.xlu1 %331 }
 0x3b3   : > { %594 = vrcp.f32 %v332_v26 }
 0x3b6   : > { %v337_v27 = vpop.permute.xlu1 %336 }
 0x3b7   : > { %v343_v28 = vsel %vm341_vm3, %v337_v27, 0 }
 0x3b8   : > { %522 = vmatpush3.bf16.msra.mxu0 %v343_v28 }
 0x3bd   : > { %v595_v29 = vpop.eup %594 }
 0x3be   : > { %v334_v30 = vmul.f32 %v595_v29, %v593_v24 }
 0x3c0   : > { %v335_v31 = vpack.c.bf16 %v334_v30, %v334_v30 }
 0x3c2   : > { %524 = vmatmul.mubr.msk.bf16.vlgmr.msra.gmra.mrb[4].mxu0 %vm323_vm2, %v335_v31 }
 0x495   : > { %v379_v32 = vpop.f32.mrb[4].mxu0 }
 0x496   : > { %385 = vst.msk [vmem:[%s200_s5] sm:$0xff] %vm227_vm1, %v379_v32  ;;  %v525_v33 = vpop.f32.mrb[5].mxu0 }
 0x497   : > { %v382_v34 = vpop.f32.mrb[6].mxu0 }
 0x498   : > { %667 = shalt.err (!%p664_p7)
}
 0x499   : > { %s668_s30 = scalar_lea.hbm %s920_s11, 128  ;;  %s672_s7 = scalar_lea.hbm %s968_s3, 256 }
 0x49a   : > { %p669_p9 = scmp.ne.s32.totalorder %s920_s11, %s668_s30  ;;  %p673_p0 = scmp.lt.u32.totalorder %s920_s11, %s968_s3 }
 0x49b   : > { %p674_p11 = scmp.lt.u32.totalorder %s672_s7, %s668_s30  ;;  %p676_p4 = scmp.lt.u32.totalorder %s668_s30, %s920_s11 }
 0x49c   : > { %p670_p2 = pnand %p669_p9, %p846_p12 }
 0x49d   : > { %p675_p1 = por %p674_p11, %p673_p0 }
 0x49e   : > { %p671_p5 = pneg %p670_p2 }
 0x49f   : > { %p677_p6 = por %p676_p4, %p675_p1 }
 0x4a1   : > { %p678_p8 = pnand %p677_p6, %p671_p5 }
 0x4a3   : > { %681 = shalt.err (!%p678_p8)
}
 0x4a4   : > { %533 = dma.vmem_to_hbm [thread:$0]  (%p846_p12), %s922_s8, 128, %s920_s11, %s387_s27   ;;  %v526_v35 = vpop.f32.mrb[7].mxu0 }
 0x4a5 PF: > { %s412_s4 = sand.u32 1, %s712_s12   ;;  %p983_p10 = scmp.ne.s32.totalorder %s973_s19, 0 }
 0x4a6   : > { %p984_p13 = scmp.ge.s32.totalorder %s724_s15, 2  ;;  %s413_s25 = scalar_lea.sflag [#allocation4], %s412_s4 }
 0x4a8   : > { %p544_p3 = pnand %p984_p13, %p983_p10 }
 0x4aa   : > { %707 = dma.done.wait (!%p544_p3), %s413_s25, 128  }
 0x4ab   : > { %709 = vsyncadd (!%p544_p3), %s413_s25, 4294967168  ;;  %p17_p7 = scmp.ge.s32.totalorder %s811_s24, 4   ;;  %s985_s12 = smov %s716_s13 }
 0x4ac   : > { %s986_s13 = smov %s720_s14  ;;  %s987_s14 = smov %s842_s17 }
 0x4ad   : > { %s988_s15 = smov %s811_s24  ;;  %19 = sbr.rel (!%p17_p7) target bundleno = 6 (0x6), region = 81 }
 0x4b4   :  { %418 = vsyncpa [#allocation3], 1 }
 0x4b5   :  { %420 = vsyncpa [#allocation3 + $0x1], 1 }
 0x4b6   :  { %421 = vsyncpa [#allocation6], 1 }
 0x4b7   :  { %422 = vsyncpa [#allocation4], 1 }
 0x4b8   :  { %424 = vsyncpa [#allocation4 + $0x1], 1 }

</bundles_post_ra>
